<compile_context>
chip_gen: v5e
topology: v5e:2x2
jax: 0.10.0
libtpu: 0.0.40
codegen_flags: <defaults>
</compile_context>

<pallas_src>
import functools

import jax
import jax.numpy as jnp
from jax import lax
from jax.experimental import pallas as pl
from jax.experimental.pallas import tpu as pltpu


def _mmd_linear_fused_kernel(x_ref, xe_ref, xo_ref, ye_ref, yo_ref, out_ref, *,
                             kernel_scales):
    f32 = jnp.float32
    B, D = x_ref.shape
    half = B // 2

    # ---- full xx = ||x_i - x_j||^2 on the MXU (needed only for its median) ----
    x_native = x_ref[...]                 # keep bf16 operands bf16 for the MXU
    x = x_native.astype(f32)
    dn = (((1,), (1,)), ((), ()))         # contract the feature dim, no batch dims
    xs = x * x                            # norms / subtraction stay in f32
    xn_col = jnp.sum(xs, axis=-1, keepdims=True)                                # (B, 1)
    ones_row = jnp.ones((1, D), f32)
    xn_row = lax.dot_general(ones_row, xs, dn, preferred_element_type=f32)      # (1, B)
    xxt = lax.dot_general(x_native, x_native, dn, preferred_element_type=f32)   # (B, B)
    xx = jnp.maximum(xn_col + xn_row - 2.0 * xxt, 0.0)

    # ---- lower median of xx (torch.median semantics: sorted[(N-1)//2]) --------
    # xx >= 0, so its f32 bit patterns order monotonically as int32; select the
    # k-th smallest with a 32-step counting bisection (exact, no sort, no extra
    # HBM traffic).
    bits = pltpu.bitcast(xx, jnp.int32)
    k = (B * B - 1) // 2

    def bisect(_, carry):
        lo, hi = carry
        mid = lo + ((hi - lo) >> 1)
        cnt = jnp.sum((bits <= mid).astype(jnp.int32))
        ge = cnt > k                                      # count(<= mid) >= k + 1
        return (jnp.where(ge, lo, mid + 1), jnp.where(ge, mid, hi))

    lo, _ = lax.fori_loop(0, 32, bisect,
                          (jnp.int32(0), jnp.int32(2**31 - 1)))
    # lo is now the bit pattern of the k-th smallest entry; recover the float via
    # a masked max (avoids a scalar bitcast), kept as (1, 1) so scale stays vector.
    sel = jnp.where(bits <= lo, xx, f32(0.0))
    median = jnp.max(jnp.max(sel, axis=1, keepdims=True), axis=0, keepdims=True)  # (1,1)
    scale = f32(-float(kernel_scales)) / median                                   # (1,1)

    # ---- O(B) adjacent-pair distances for the linear estimator (VPU) ----------
    xe = xe_ref[...].astype(f32)          # x[0::2]
    xo = xo_ref[...].astype(f32)          # x[1::2]
    ye = ye_ref[...].astype(f32)          # y[0::2]
    yo = yo_ref[...].astype(f32)          # y[1::2]
    d_xx = jnp.sum((xe - xo) ** 2, axis=-1, keepdims=True)   # xx[2k, 2k+1]
    d_yy = jnp.sum((ye - yo) ** 2, axis=-1, keepdims=True)   # yy[2k, 2k+1]
    d_z1 = jnp.sum((xe - yo) ** 2, axis=-1, keepdims=True)   # zz[2k, 2k+1]
    d_z2 = jnp.sum((xo - ye) ** 2, axis=-1, keepdims=True)   # zz[2k+1, 2k]

    terms = (jnp.exp(d_xx * scale) + jnp.exp(d_yy * scale)
             - jnp.exp(d_z1 * scale) - jnp.exp(d_z2 * scale))                    # (B/2, 1)
    out_ref[0, 0] = jnp.sum(terms) / f32(half)


def mmd_loss(x, y, kernel_scales=1.0):
    """MMDLoss(kernel_scales=<float>, mmd_type='linear').forward(x, y), 2-D inputs."""
    B, D = x.shape
    assert y.shape == (B, D) and B % 2 == 0

    # Even/odd row splits (trivial XLA slices) so the kernel never needs strided
    # sublane loads; total HBM traffic is 3*B*D input floats + a 4-byte output.
    xe, xo = x[0::2], x[1::2]
    ye, yo = y[0::2], y[1::2]

    kernel = functools.partial(_mmd_linear_fused_kernel,
                               kernel_scales=float(kernel_scales))
    vmem = pl.BlockSpec(memory_space=pltpu.MemorySpace.VMEM)
    loss = pl.pallas_call(
        kernel,
        out_shape=jax.ShapeDtypeStruct((1, 1), jnp.float32),
        in_specs=[vmem] * 5,
        out_specs=pl.BlockSpec(memory_space=pltpu.MemorySpace.SMEM),
        compiler_params=pltpu.CompilerParams(
            vmem_limit_bytes=32 * 1024 * 1024),   # > v5e's 16 MiB scoped default
    )(x, xe, xo, ye, yo)
    return loss[0, 0]


def mmd_loss_ref(x, y, kernel_scales=1.0):
    """Pure-JAX reference mirroring the PyTorch module."""
    def d2(a, b):
        return jnp.sum((a[:, None, :] - b[None, :, :]) ** 2, axis=-1)

    xx, yy, zz = d2(x, x), d2(y, y), d2(x, y)
    flat = jnp.sort(xx.reshape(-1))
    scale = (-1.0 / flat[(flat.size - 1) // 2]) * kernel_scales
    B = x.shape[0]
    s1 = jnp.arange(B // 2) * 2
    s2 = s1 + 1
    l1 = jnp.sum(jnp.exp(xx[s1, s2] * scale))
    l2 = jnp.sum(jnp.exp(yy[s1, s2] * scale))
    l3 = jnp.sum(jnp.exp(zz[s1, s2] * scale))
    l4 = jnp.sum(jnp.exp(zz[s2, s1] * scale))
    return (l1 + l2 - l3 - l4) / float(B // 2)


if __name__ == "__main__":
    key = jax.random.PRNGKey(0)
    kx, ky = jax.random.split(key)
    B, D = 8, 32  # batch of features from each domain, hidden dim 32
    x = jax.random.normal(kx, (B, D), dtype=jnp.float32)
    y = jax.random.normal(ky, (B, D), dtype=jnp.float32) + 0.5

    out = jax.block_until_ready(mmd_loss(x, y))
    ref = mmd_loss_ref(x, y)
    assert jnp.allclose(out, ref, atol=1e-5, rtol=1e-5), (out, ref)
    print("KERNEL_OK")
</pallas_src>

<mosaic_0001>
module attributes {stable_mosaic.version = 11 : i64} {
  func.func @_mmd_linear_fused_kernel(%arg0: memref<8x32xf32, #tpu.memory_space<vmem>>, %arg1: memref<4x32xf32, #tpu.memory_space<vmem>>, %arg2: memref<4x32xf32, #tpu.memory_space<vmem>>, %arg3: memref<4x32xf32, #tpu.memory_space<vmem>>, %arg4: memref<4x32xf32, #tpu.memory_space<vmem>>, %arg5: memref<1x1xf32, #tpu.memory_space<smem>>) attributes {dimension_semantics = [], scalar_prefetch = 0 : i64, scratch_operands = 0 : i64, tpu.core_type = #tpu.core_type<tc>} {
    %c0 = arith.constant 0 : index
    %c0_0 = arith.constant 0 : index
    %0 = vector.load %arg0[%c0, %c0_0] : memref<8x32xf32, #tpu.memory_space<vmem>>, vector<8x32xf32>
    %1 = arith.mulf %0, %0 : vector<8x32xf32>
    %cst = arith.constant dense<0.000000e+00> : vector<8xf32>
    %2 = vector.multi_reduction <add>, %1, %cst [1] : vector<8x32xf32> to vector<8xf32>
    %3 = vector.shape_cast %2 : vector<8xf32> to vector<8x1xf32>
    %cst_1 = arith.constant 1.000000e+00 : f32
    %4 = vector.broadcast %cst_1 : f32 to vector<1x32xf32>
    %cst_2 = arith.constant dense<0.000000e+00> : vector<1x8xf32>
    %5 = tpu.matmul %4, %1, %cst_2 {dimension_numbers = #tpu.dot_dimension_numbers<[1], [1], [0], [0], [0, 0, 1, 0], [], []>} : vector<1x32xf32>, vector<8x32xf32>, vector<1x8xf32> -> vector<1x8xf32>
    %cst_3 = arith.constant dense<0.000000e+00> : vector<8x8xf32>
    %6 = tpu.matmul %0, %0, %cst_3 {dimension_numbers = #tpu.dot_dimension_numbers<[1], [1], [0], [0], [0, 0, 1, 0], [], []>} : vector<8x32xf32>, vector<8x32xf32>, vector<8x8xf32> -> vector<8x8xf32>
    %7 = vector.broadcast %3 : vector<8x1xf32> to vector<8x8xf32>
    %8 = vector.broadcast %5 : vector<1x8xf32> to vector<8x8xf32>
    %9 = arith.addf %7, %8 : vector<8x8xf32>
    %cst_4 = arith.constant 2.000000e+00 : f32
    %10 = vector.broadcast %cst_4 : f32 to vector<8x8xf32>
    %11 = arith.mulf %10, %6 : vector<8x8xf32>
    %12 = arith.subf %9, %11 : vector<8x8xf32>
    %cst_5 = arith.constant 0.000000e+00 : f32
    %13 = vector.broadcast %cst_5 : f32 to vector<8x8xf32>
    %14 = arith.maximumf %12, %13 : vector<8x8xf32>
    %15 = tpu.bitcast %14 : vector<8x8xf32> -> vector<8x8xi32>
    %c0_i32 = arith.constant 0 : i32
    %c2147483647_i32 = arith.constant 2147483647 : i32
    %c0_i32_6 = arith.constant 0 : i32
    %c32_i32 = arith.constant 32 : i32
    %16 = arith.addi %c0_i32_6, %c32_i32 : i32
    %c1_i32 = arith.constant 1 : i32
    %17:2 = scf.for %arg6 = %c0_i32_6 to %16 step %c1_i32 iter_args(%arg7 = %c0_i32, %arg8 = %c2147483647_i32) -> (i32, i32)  : i32 {
      %69 = arith.subi %arg8, %arg7 : i32
      %c1_i32_27 = arith.constant 1 : i32
      %70 = arith.shrsi %69, %c1_i32_27 : i32
      %71 = arith.addi %arg7, %70 : i32
      %72 = vector.broadcast %71 : i32 to vector<8x8xi32>
      %73 = arith.cmpi sle, %15, %72 : vector<8x8xi32>
      %74 = arith.extui %73 : vector<8x8xi1> to vector<8x8xi32>
      %75 = vector.shape_cast %74 : vector<8x8xi32> to vector<1x8x8xi32>
      %cst_28 = arith.constant dense<0> : vector<1xi32>
      %76 = vector.multi_reduction <add>, %75, %cst_28 [1, 2] : vector<1x8x8xi32> to vector<1xi32>
      %77 = vector.shape_cast %76 : vector<1xi32> to vector<1x1x1xi32>
      %78 = vector.extract %77[0, 0, 0] : i32 from vector<1x1x1xi32>
      %c31_i32 = arith.constant 31 : i32
      %79 = arith.cmpi sgt, %78, %c31_i32 : i32
      %c1_i32_29 = arith.constant 1 : i32
      %80 = arith.addi %71, %c1_i32_29 : i32
      %81 = arith.select %79, %arg7, %80 : i32
      %82 = arith.select %79, %71, %arg8 : i32
      scf.yield %81, %82 : i32, i32
    }
    %18 = vector.broadcast %17#0 : i32 to vector<8x8xi32>
    %19 = arith.cmpi sle, %15, %18 : vector<8x8xi32>
    %cst_7 = arith.constant 0.000000e+00 : f32
    %20 = vector.broadcast %cst_7 : f32 to vector<8x8xf32>
    %21 = arith.select %19, %14, %20 : vector<8x8xi1>, vector<8x8xf32>
    %cst_8 = arith.constant dense<0xFF800000> : vector<8xf32>
    %22 = vector.multi_reduction <maximumf>, %21, %cst_8 [1] : vector<8x8xf32> to vector<8xf32>
    %23 = vector.shape_cast %22 : vector<8xf32> to vector<8x1xf32>
    %cst_9 = arith.constant dense<0xFF800000> : vector<1xf32>
    %24 = vector.multi_reduction <maximumf>, %23, %cst_9 [0] : vector<8x1xf32> to vector<1xf32>
    %25 = vector.shape_cast %24 : vector<1xf32> to vector<1x1xf32>
    %cst_10 = arith.constant -1.000000e+00 : f32
    %26 = vector.broadcast %cst_10 : f32 to vector<1x1xf32>
    %27 = arith.divf %26, %25 : vector<1x1xf32>
    %c0_11 = arith.constant 0 : index
    %c0_12 = arith.constant 0 : index
    %28 = vector.load %arg1[%c0_11, %c0_12] : memref<4x32xf32, #tpu.memory_space<vmem>>, vector<4x32xf32>
    %c0_13 = arith.constant 0 : index
    %c0_14 = arith.constant 0 : index
    %29 = vector.load %arg2[%c0_13, %c0_14] : memref<4x32xf32, #tpu.memory_space<vmem>>, vector<4x32xf32>
    %c0_15 = arith.constant 0 : index
    %c0_16 = arith.constant 0 : index
    %30 = vector.load %arg3[%c0_15, %c0_16] : memref<4x32xf32, #tpu.memory_space<vmem>>, vector<4x32xf32>
    %c0_17 = arith.constant 0 : index
    %c0_18 = arith.constant 0 : index
    %31 = vector.load %arg4[%c0_17, %c0_18] : memref<4x32xf32, #tpu.memory_space<vmem>>, vector<4x32xf32>
    %32 = arith.subf %28, %29 : vector<4x32xf32>
    %33 = arith.mulf %32, %32 : vector<4x32xf32>
    %cst_19 = arith.constant dense<0.000000e+00> : vector<4xf32>
    %34 = vector.multi_reduction <add>, %33, %cst_19 [1] : vector<4x32xf32> to vector<4xf32>
    %35 = vector.shape_cast %34 : vector<4xf32> to vector<4x1xf32>
    %36 = arith.subf %30, %31 : vector<4x32xf32>
    %37 = arith.mulf %36, %36 : vector<4x32xf32>
    %cst_20 = arith.constant dense<0.000000e+00> : vector<4xf32>
    %38 = vector.multi_reduction <add>, %37, %cst_20 [1] : vector<4x32xf32> to vector<4xf32>
    %39 = vector.shape_cast %38 : vector<4xf32> to vector<4x1xf32>
    %40 = arith.subf %28, %31 : vector<4x32xf32>
    %41 = arith.mulf %40, %40 : vector<4x32xf32>
    %cst_21 = arith.constant dense<0.000000e+00> : vector<4xf32>
    %42 = vector.multi_reduction <add>, %41, %cst_21 [1] : vector<4x32xf32> to vector<4xf32>
    %43 = vector.shape_cast %42 : vector<4xf32> to vector<4x1xf32>
    %44 = arith.subf %29, %30 : vector<4x32xf32>
    %45 = arith.mulf %44, %44 : vector<4x32xf32>
    %cst_22 = arith.constant dense<0.000000e+00> : vector<4xf32>
    %46 = vector.multi_reduction <add>, %45, %cst_22 [1] : vector<4x32xf32> to vector<4xf32>
    %47 = vector.shape_cast %46 : vector<4xf32> to vector<4x1xf32>
    %48 = vector.broadcast %27 : vector<1x1xf32> to vector<4x1xf32>
    %49 = arith.mulf %35, %48 : vector<4x1xf32>
    %50 = math.exp %49 : vector<4x1xf32>
    %51 = vector.broadcast %27 : vector<1x1xf32> to vector<4x1xf32>
    %52 = arith.mulf %39, %51 : vector<4x1xf32>
    %53 = math.exp %52 : vector<4x1xf32>
    %54 = arith.addf %50, %53 : vector<4x1xf32>
    %55 = vector.broadcast %27 : vector<1x1xf32> to vector<4x1xf32>
    %56 = arith.mulf %43, %55 : vector<4x1xf32>
    %57 = math.exp %56 : vector<4x1xf32>
    %58 = arith.subf %54, %57 : vector<4x1xf32>
    %59 = vector.broadcast %27 : vector<1x1xf32> to vector<4x1xf32>
    %60 = arith.mulf %47, %59 : vector<4x1xf32>
    %61 = math.exp %60 : vector<4x1xf32>
    %62 = arith.subf %58, %61 : vector<4x1xf32>
    %63 = vector.shape_cast %62 : vector<4x1xf32> to vector<1x4x1xf32>
    %cst_23 = arith.constant dense<0.000000e+00> : vector<1xf32>
    %64 = vector.multi_reduction <add>, %63, %cst_23 [1, 2] : vector<1x4x1xf32> to vector<1xf32>
    %65 = vector.shape_cast %64 : vector<1xf32> to vector<1x1x1xf32>
    %66 = vector.extract %65[0, 0, 0] : f32 from vector<1x1x1xf32>
    %cst_24 = arith.constant 4.000000e+00 : f32
    %67 = arith.divf %66, %cst_24 : f32
    %c0_25 = arith.constant 0 : index
    %c0_26 = arith.constant 0 : index
    %68 = memref.load %arg5[%c0_25, %c0_26] : memref<1x1xf32, #tpu.memory_space<smem>>
    memref.store %67, %arg5[%c0_25, %c0_26] : memref<1x1xf32, #tpu.memory_space<smem>>
    return
  }
}

</mosaic_0001>

<bundles_post_ra>
// kernel: tpu_custom_call.1
= control target key start
LH: loop header
LB: loop body
LE: loop exit
PB: predicated region body
PF: predicated region fallthrough
CT: control target
= control target key end

     0   :  { %10 = vsyncpa [#allocation3], 0  ;;  %s618_s0 = inlined_call_operand.hbm [shape: f32[8,32], index: 0, kind: input, shape index: {}]   ;;  %s619_s1 = inlined_call_operand.hbm [shape: f32[4,32], index: 1, kind: input, shape index: {}]   ;;  %s620_s2 = inlined_call_operand.hbm [shape: f32[4,32], index: 2, kind: input, shape index: {}]   ;;  %s621_s3 = inlined_call_operand.hbm [shape: f32[4,32], index: 3, kind: input, shape index: {}]   ;;  %s622_s4 = inlined_call_operand.hbm [shape: f32[4,32], index: 4, kind: input, shape index: {}]   ;;  %s623_s5 = inlined_call_operand.hbm [shape: f32[1,1], index: 5, kind: output, shape index: {}]  }
   0x1   :  { %11 = vsyncpa [#allocation6], 0 }
   0x2   :  { %12 = vsyncpa [#allocation9], 0  ;;  %s30_s20 = sshll.u32 %s619_s1, 4  ;;  %s31_s20 = int_to_ptr.hbm [resolvable:$true] %s30_s20 }
   0x3   :  { %13 = vsyncpa [#allocation4], 0  ;;  %s527_s21 = smov [#allocation5]   ;;  %s52_s25 = sshll.u32 %s621_s3, 4  ;;  %s53_s25 = int_to_ptr.hbm [resolvable:$true] %s52_s25 }
   0x4   :  { %s32_s22 = sshll.u32 %s527_s21, 4  ;;  %s528_s26 = smov [#allocation8]   ;;  %s33_s22 = int_to_ptr.vmem [resolvable:$true] %s32_s22 }
   0x5   :  { %35 = dma.hbm_to_vmem [thread:$0]  %s31_s20, 64, %s33_s22, [#allocation6]  }
   0x6   :  { %s54_s27 = sshll.u32 %s528_s26, 4  ;;  %s19_s30 = sshll.u32 %s618_s0, 4  ;;  %s55_s27 = int_to_ptr.vmem [resolvable:$true] %s54_s27  ;;  %s20_s30 = int_to_ptr.hbm [resolvable:$true] %s19_s30 }
   0x7   :  { %57 = dma.hbm_to_vmem [thread:$0]  %s53_s25, 64, %s55_s27, [#allocation9]  }
   0x8   :  { %s41_s7 = sshll.u32 %s620_s2, 4  ;;  %s529_s8 = smov [#allocation2]   ;;  %s42_s7 = int_to_ptr.hbm [resolvable:$true] %s41_s7 }
   0x9   :  { %s21_s9 = sshll.u32 %s529_s8, 4  ;;  %s530_s3 = smov [#allocation7]   ;;  %s22_s9 = int_to_ptr.vmem [resolvable:$true] %s21_s9 }
   0xa   :  { %24 = dma.hbm_to_vmem [thread:$0]  %s20_s30, 128, %s22_s9, [#allocation3]  }
   0xb   :  { %s43_s10 = sshll.u32 %s530_s3, 4  ;;  %s63_s13 = sshll.u32 %s622_s4, 4  ;;  %s44_s10 = int_to_ptr.vmem [resolvable:$true] %s43_s10  ;;  %s64_s13 = int_to_ptr.hbm [resolvable:$true] %s63_s13 }
   0xc   :  { %46 = dma.hbm_to_vmem [thread:$0]  %s42_s7, 64, %s44_s10, [#allocation6]  }
   0xd   :  { %s531_s0 = smov [#allocation10]  }
   0xe   :  { %s65_s14 = sshll.u32 %s531_s0, 4  ;;  %s66_s14 = int_to_ptr.vmem [resolvable:$true] %s65_s14 }
   0xf   :  { %68 = dma.hbm_to_vmem [thread:$0]  %s64_s13, 64, %s66_s14, [#allocation9]  }
  0x10   :  { %507 = dma.done.wait [#allocation3], 128  }
  0x11   :  { %508 = vsyncadd [#allocation3], 4294967168 }
  0x12   :  { %509 = dma.done.wait [#allocation6], 128  }
  0x13   :  { %510 = vsyncadd [#allocation6], 4294967168 }
  0x14   :  { %511 = dma.done.wait [#allocation9], 128  }
  0x15   :  { %512 = vsyncadd [#allocation9], 4294967168  ;;  %v89_v0 = vld [vmem:[#allocation2] sm:$0xff]  ;;  %vm91_vm0 = vcmask 261120   ;;  %v532_v3 = vmov 1.0   ;;  %s583_s4 = smov 0  }
  0x16   :  { %v90_v1 = vmul.f32 %v89_v0, %v89_v0  ;;  %310 = vmatpush.xpose.msk.msra.mxu1 %vm91_vm0, %v89_v0  ;;  %s581_s2 = smov 2147483647   ;;  %s585_s15 = smov 0  }
  0x18   :  { %308 = vmatpush.xpose.msk.msra.mxu0 %vm91_vm0, %v90_v1  ;;  %v92_v2 = vsel %vm91_vm0, %v90_v1, 0.0 }
  0x19   :  { %311 = vmatmul.msk.f32.vlgmr.msra.gmra.mxu1 %vm91_vm0, %v89_v0  ;;  %93 = vadd.xlane.f32.xlu0 %v92_v2 }
  0x1b   :  { %309 = vmatmul.msk.f32.vlgmr.msra.gmra.mxu0 %vm91_vm0, %v532_v3 }
  0x8c   :  { %v94_v6 = vpop.xlane.xlu0 %93 }
  0x96   :  { %v141_v4 = vpop.f32.mrf.mxu1 }
  0x97   :  { %v146_v8 = vmul.f32 2.0, %v141_v4 }
  0x98   :  { %v118_v5 = vpop.f32.mrf.mxu0 }
  0x99   :  { %v144_v7 = vperm.slane %v118_v5, 0 }
  0x9b   :  { %v145_v9 = vadd.f32 %v144_v7, %v94_v6 }
  0x9d   :  { %v147_v10 = vsub.f32 %v145_v9, %v146_v8 }
  0x9f   :  { %v148_v11 = vmax.f32 %v147_v10, 0.0 }
  0xa0 LB: > { %s158_s16 = ssub.s32 %s517_s2, %s521_s4  ;;  %vm164_vm1 = vcmask 64512   ;;  %v533_v13 = vmov 0   ;;  %s155_s15 = sadd.s32 1, %s525_s15   ;;  %s525_s15 = sphi %s585_s15, %s155_s15   ;;  %s521_s4 = sphi %s583_s4, %s625_s4   ;;  %s517_s2 = sphi %s581_s2, %s624_s2  }
  0xa1   : > { %s159_s17 = sshra.s32 %s158_s16, 1  ;;  %p152_p1 = scmp.ge.s32.totalorder %s155_s15, 32  }
  0xa2   : > { %s599_s18 = sadd.s32 %s521_s4, %s159_s17  ;;  %v219_v33 = vld [vmem:[#allocation8] sm:$0xf] (%p152_p1)  ;;  %v220_v34 = vld [vmem:[#allocation10] sm:$0xf] (%p152_p1)  ;;  %v218_v36 = vld [vmem:[#allocation7] sm:$0xf] (%p152_p1) }
  0xa3   : > { %v161_v12 = vstv %s599_s18  ;;  %s186_s20 = sadd.s32 1, %s599_s18  ;;  %v227_v35 = vsub.f32 (%p152_p1), %v219_v33, %v220_v34  ;;  %v217_v37 = vld [vmem:[#allocation5] sm:$0xf] (%p152_p1)  ;;  %vm223_vm4 = vcmask (%p152_p1), 257024   ;;  %v237_v39 = vsub.f32 (%p152_p1), %v218_v36, %v219_v33  ;;  %s284_s24 = sshll.u32 (%p152_p1), %s623_s5, 4  ;;  %s285_s24 = int_to_ptr.hbm [resolvable:$true] %s284_s24 }
  0xa4   : > { %vm162_vm2 = vcmp.le.s32.totalorder %v148_v11, %v161_v12  ;;  %v221_v40 = vsub.f32 (%p152_p1), %v217_v37, %v218_v36  ;;  %v232_v43 = vsub.f32 (%p152_p1), %v217_v37, %v220_v34  ;;  %vm257_vm9 = vcmask (%p152_p1), 3072   ;;  %s535_s28 = smov (%p152_p1), [#allocation11]  }
  0xa5   : > { %v163_v14 = vsel %vm162_vm2, 1, %v533_v13  ;;  %v228_v42 = vmul.f32 (%p152_p1), %v227_v35, %v227_v35  ;;  %v238_v44 = vmul.f32 (%p152_p1), %v237_v39, %v237_v39 }
  0xa6   : > { %v165_v15 = vsel %vm164_vm1, %v163_v14, 0  ;;  %v222_v46 = vmul.f32 (%p152_p1), %v221_v40, %v221_v40  ;;  %v233_v48 = vmul.f32 (%p152_p1), %v232_v43, %v232_v43 }
  0xa7   : > { %v167_v16 = vshrl.u32 %v165_v15, 16  ;;  %v166_v18 = vand.u32 65535, %v165_v15  ;;  %v229_v45 = vsel (%p152_p1), %vm223_vm4, %v228_v42, 0.0  ;;  %v239_v47 = vsel (%p152_p1), %vm223_vm4, %v238_v44, 0.0 }
  0xa8   :  { %230 = vadd.xlane.f32.xlu1 (%p152_p1), %v229_v45  ;;  %240 = vadd.xlane.f32.xlu2 (%p152_p1), %v239_v47  ;;  %v224_v49 = vsel (%p152_p1), %vm223_vm4, %v222_v46, 0.0  ;;  %v234_v50 = vsel (%p152_p1), %vm223_vm4, %v233_v48, 0.0 }
  0xa9   : > { %v169_v17 = vcvt.s32.f32 %v167_v16  ;;  %v168_v19 = vcvt.s32.f32 %v166_v18 }
  0xab   : > { %172 = vadd.xlane.f32.xlu0 %v169_v17 }
  0xb0   :  { %235 = vadd.xlane.f32.xlu1 (%p152_p1), %v234_v50 }
  0xb3   : > { %170 = vadd.xlane.f32.xlu0 %v168_v19 }
 0x11b   :  { %v231_v60 = vpop.xlane.xlu1 (%p152_p1), %230  ;;  %v241_v9 = vpop.xlane.xlu2 (%p152_p1), %240 }
 0x11e   : > { %v173_v20 = vpop.xlane.xlu0 %172 }
 0x11f   : > { %v175_v21 = vcvt.f32.s32 %v173_v20 }
 0x121   : > { %v176_v23 = vshll.u32 %v175_v21, 16 }
 0x123   :  { %v236_v7 = vpop.xlane.xlu1 (%p152_p1), %235 }
 0x126   : > { %v171_v22 = vpop.xlane.xlu0 %170 }
 0x127   : > { %v174_v24 = vcvt.f32.s32 %v171_v22 }
 0x129   : > { %v177_v25 = vadd.s32 %v176_v23, %v174_v24 }
 0x12b   : > { %v178_v26 = vrot.slane %v177_v25, 4 }
 0x12d   : > { %v179_v27 = vadd.s32 %v178_v26, %v177_v25  ;;  %v534_v25 = vmov (%p152_p1), 4.0  }
 0x12f   : > { %v180_v28 = vrot.slane %v179_v27, 2 }
 0x131   : > { %v181_v29 = vadd.s32 %v180_v28, %v179_v27 }
 0x133   : > { %v182_v30 = vrot.slane %v181_v29, 1 }
 0x135   : > { %v183_v31 = vadd.s32 %v182_v30, %v181_v29 }
 0x137   : > { %312 = vpush %v183_v31 }
 0x168   : > { %s313_s19 = spop %312 }
 0x169   : > { %p185_p0 = scmp.gt.s32.totalorder %s313_s19, 31  ;;  %154 = sbr.rel (!%p152_p1) target bundleno = 160 (0xa0), region = 68 }
 0x16b   : > { %s187_s21 = scalar_select %p185_p0, %s521_s4, %s186_s20  }
 0x16c   : > { %s627_s18 = smov (!%p185_p0, %s599_s18), %s517_s2 }
 0x16d   : > { %s624_s2 = smov %s627_s18  ;;  %s625_s4 = smov %s187_s21  ;;  %v189_v32 = vstv (%p152_p1), %s187_s21 }
 0x16e   :  { %vm190_vm3 = vcmp.le.s32.totalorder %v148_v11, %v189_v32 }
 0x16f   :  { %v191_v38 = vsel %vm190_vm3, %v148_v11, 0.0 }
 0x170   :  { %v193_v41 = vsel %vm164_vm1, %v191_v38, -inf }
 0x171   :  { %194 = vmax.xlane.f32.xlu0 %v193_v41 }
 0x179   :  { %225 = vadd.xlane.f32.xlu0 %v224_v49 }
 0x1e4   :  { %v195_v51 = vpop.xlane.xlu0 %194 }
 0x1e5   :  { %v196_v52 = vrot.slane %v195_v51, 4 }
 0x1e7   :  { %v197_v53 = vmax.f32 %v195_v51, %v196_v52 }
 0x1e9   :  { %v198_v54 = vrot.slane %v197_v53, 2 }
 0x1eb   :  { %v199_v55 = vmax.f32 %v197_v53, %v198_v54 }
 0x1ec   :  { %v226_v5 = vpop.xlane.xlu0 %225 }
 0x1ed   :  { %v200_v56 = vrot.slane %v199_v55, 1 }
 0x1ef   :  { %v201_v57 = vmax.f32 %v199_v55, %v200_v56 }
 0x1f1   :  { %351 = vrcp.f32 %v201_v57  ;;  %v213_v62 = vand.u32 2147483648, %v201_v57  ;;  %v211_v0 = vand.u32 2147483647, %v201_v57  ;;  %vm207_vm6 = vweird.f32 %v201_v57 }
 0x1f3   :  { %v214_v2 = vor.u32 1.1754944e-38, %v213_v62  ;;  %vm212_vm8 = vcmp.eq.f32.partialorder %v211_v0, 8.507059e+37 }
 0x1f7   :  { %v352_v58 = vpop.eup %351 }
 0x1f8   :  { %v203_v59 = vmul.f32 %v352_v58, %v201_v57  ;;  %vm208_vm5 = vweird.f32 %v352_v58 }
 0x1f9   :  { %vm209_vm7 = vmor %vm207_vm6, %vm208_vm5 }
 0x1fa   :  { %v204_v61 = vsub.f32 1.0, %v203_v59 }
 0x1fc   :  { %v205_v63 = vmul.f32 %v352_v58, %v204_v61 }
 0x1fe   :  { %v206_v1 = vadd.f32 %v352_v58, %v205_v63 }
 0x200   :  { %v210_v3 = vsel %vm209_vm7, %v352_v58, %v206_v1 }
 0x201   :  { %v215_v4 = vsel %vm212_vm8, %v214_v2, %v210_v3 }
 0x202   :  { %v216_v6 = vmul.f32 -1.0, %v215_v4 }
 0x204   :  { %v245_v8 = vmul.f32 %v231_v60, %v216_v6  ;;  %v242_v10 = vmul.f32 %v226_v5, %v216_v6  ;;  %v249_v11 = vmul.f32 %v236_v7, %v216_v6  ;;  %v253_v13 = vmul.f32 %v241_v9, %v216_v6 }
 0x206   :  { %v246_v12 = vmul.f32 1.442695, %v245_v8  ;;  %v243_v14 = vmul.f32 1.442695, %v242_v10  ;;  %v250_v15 = vmul.f32 1.442695, %v249_v11 }
 0x207   :  { %v254_v16 = vmul.f32 1.442695, %v253_v13 }
 0x208   :  { %353 = vpow2.f32 %v246_v12 }
 0x209   :  { %355 = vpow2.f32 %v243_v14 }
 0x20a   :  { %357 = vpow2.f32 %v250_v15 }
 0x20b   :  { %359 = vpow2.f32 %v254_v16 }
 0x20c   :  { %361 = vrcp.f32 %v534_v25 }
 0x20e   :  { %v354_v17 = vpop.eup %353 }
 0x20f   :  { %v356_v18 = vpop.eup %355 }
 0x210   :  { %v248_v19 = vadd.f32 %v356_v18, %v354_v17  ;;  %v358_v20 = vpop.eup %357 }
 0x211   :  { %v360_v22 = vpop.eup %359 }
 0x212   :  { %v252_v21 = vsub.f32 %v248_v19, %v358_v20  ;;  %v362_v26 = vpop.eup %361 }
 0x213   :  { %v269_v27 = vmul.f32 4.0, %v362_v26  ;;  %vm273_vm10 = vweird.f32 %v362_v26 }
 0x214   :  { %v256_v23 = vsub.f32 %v252_v21, %v360_v22 }
 0x215   :  { %v270_v28 = vsub.f32 1.0, %v269_v27 }
 0x216   :  { %v258_v24 = vsel %vm257_vm9, %v256_v23, 0.0 }
 0x217   :  { %259 = vadd.xlane.f32.xlu2 %v258_v24  ;;  %v271_v32 = vmul.f32 %v362_v26, %v270_v28 }
 0x219   :  { %v272_v35 = vadd.f32 %v362_v26, %v271_v32 }
 0x21b   :  { %v274_v38 = vsel %vm273_vm10, %v362_v26, %v272_v35 }
 0x28a   :  { %v260_v29 = vpop.xlane.xlu2 %259 }
 0x28b   :  { %v261_v30 = vrot.slane %v260_v29, 4 }
 0x28d   :  { %v262_v31 = vadd.f32 %v261_v30, %v260_v29 }
 0x28f   :  { %v263_v33 = vrot.slane %v262_v31, 2 }
 0x291   :  { %v264_v34 = vadd.f32 %v263_v33, %v262_v31 }
 0x293   :  { %v265_v36 = vrot.slane %v264_v34, 1 }
 0x295   :  { %v266_v37 = vadd.f32 %v265_v36, %v264_v34 }
 0x297   :  { %314 = vpush %v266_v37 }
 0x298   :  { %316 = vpush %v274_v38 }
 0x2c8   :  { %s315_s25 = spop %314 }
 0x2c9   :  { %s317_s26 = spop %316 }
 0x2ca   :  { %s276_s27 = smul.f32 %s317_s26, %s315_s25 }
 0x2cc   :  { %278 = sst [smem:[#allocation11]] %s276_s27 }
 0x2cd   :  { %287 = dma.smem_to_hbm %s535_s28, 16, %s285_s24, [#allocation4]  }
 0x2ce   :  { %513 = dma.done.wait [#allocation4], 16  }
 0x2cf   :  { %514 = vsyncadd [#allocation4], 4294967280 }
 0x2d0   :  { %292 = sfence }
 0x2d1   :  { %293 = vsyncpa [#allocation3], 1 }
 0x2d2   :  { %294 = vsyncpa [#allocation6], 1 }
 0x2d3   :  { %295 = vsyncpa [#allocation9], 1 }
 0x2d4   :  { %296 = vsyncpa [#allocation4], 1 }

</bundles_post_ra>
